<compile_context>
chip_gen: v7x
topology: tpu7x:2x2x1
jax: 0.10.0
libtpu: 0.0.40
codegen_flags: <defaults>
</compile_context>

<pallas_src>
import jax
import jax.numpy as jnp
from jax.experimental import pallas as pl
from jax.experimental.pallas import tpu as pltpu


_LANE = 128
# Scoped-VMEM we request: 32 MiB is the default on v6e/v7x and safely below
# every generation's physical VMEM; fast path budgets 24 MiB for headroom.
_VMEM_LIMIT_BYTES = 32 * 1024 * 1024
_FAST_PATH_VMEM_BUDGET = 24 * 1024 * 1024


def _round_up(x: int, m: int) -> int:
    return ((x + m - 1) // m) * m


def _cdiv(a: int, b: int) -> int:
    return (a + b - 1) // b


def _sublane_align(*dtypes) -> int:
    """Batch-tile sublane alignment: 8 (4-byte), 16 (2-byte), 32 (1-byte)."""
    a = 8
    for dt in dtypes:
        a = max(a, 32 // jnp.dtype(dt).itemsize)
    return a


def _pick_tile(dim_padded: int, target: int, align: int) -> int:
    """Largest multiple of `align`, <= target, that divides dim_padded."""
    t = min((target // align) * align, dim_padded)
    while t > align and dim_padded % t:
        t -= align
    return max(t, align)


def _choose_batch_tile(batch: int, align: int, target: int):
    """Pick (tm, Bp) bounding batch-pad waste without pathologically tiny tiles."""
    b_aligned = _round_up(batch, align)
    if b_aligned <= target:
        return b_aligned, b_aligned            # padding < align rows
    tm = _pick_tile(b_aligned, target, align)   # exact divisor -> zero extra pad
    if tm * 4 >= target:
        return tm, b_aligned
    tm = (target // align) * align              # fall back to padded last tile
    return tm, _round_up(batch, tm)


# --------------------------------------------------------------------------
# Kernels
# --------------------------------------------------------------------------
def _proj_kernel_resident(x_ref, w_ref, o_ref):
    """Fast path: one batch tile per grid step; full weight stays VMEM-resident
    (its block index is constant across the grid, so it is fetched once)."""
    o_ref[...] = jnp.dot(
        x_ref[...], w_ref[...], preferred_element_type=jnp.float32
    ).astype(o_ref.dtype)


def _proj_kernel_ksplit(x_ref, w_ref, o_ref, acc_ref):
    """Fallback for huge weights: (i, j, k) grid with f32 VMEM accumulator."""
    @pl.when(pl.program_id(2) == 0)
    def _():
        acc_ref[...] = jnp.zeros_like(acc_ref)

    acc_ref[...] += jnp.dot(
        x_ref[...], w_ref[...], preferred_element_type=jnp.float32
    )

    @pl.when(pl.program_id(2) == pl.num_programs(2) - 1)
    def _():
        o_ref[...] = acc_ref[...].astype(o_ref.dtype)


# --------------------------------------------------------------------------
# Host-side API
# --------------------------------------------------------------------------
def prepare_projection_weight(weight, *, compute_dtype=None):
    """One-time relayout of an nn.Linear weight for apply_projection().

    Pads (C_out, C_in) to multiples of 128, optionally casts to compute_dtype
    (bf16 recommended on TPU), and transposes to (Kp, Np) so the kernel runs a
    plain (M,K)x(K,N) dot.  For a persistent parameter, call this once and
    reuse the result across forward calls (amortizes all pad/cast/transpose).
    """
    c_out, c_in = weight.shape
    kp, np_ = _round_up(c_in, _LANE), _round_up(c_out, _LANE)
    w = weight.astype(compute_dtype) if compute_dtype is not None else weight
    w = w.T  # (C_in, C_out)
    if (kp, np_) != (c_in, c_out):
        w = jnp.pad(w, ((0, kp - c_in), (0, np_ - c_out)))
    return w


def apply_projection(
    lower_level,
    w_prepared,
    out_features: int,
    *,
    tm_target: int = 512,
    tn_target: int = 512,
    tk_target: int = 512,
    _vmem_budget: int = _FAST_PATH_VMEM_BUDGET,
):
    """(B, C_in) activations @ prepared weight -> (B, out_features)."""
    batch, c_in = lower_level.shape
    kp, np_ = w_prepared.shape
    assert kp % _LANE == 0 and np_ % _LANE == 0
    assert kp >= c_in and np_ >= out_features

    out_dtype = lower_level.dtype
    mxu_dtype = w_prepared.dtype
    x = lower_level if lower_level.dtype == mxu_dtype else lower_level.astype(mxu_dtype)

    x_bytes = jnp.dtype(mxu_dtype).itemsize
    w_bytes = jnp.dtype(mxu_dtype).itemsize
    o_bytes = jnp.dtype(out_dtype).itemsize
    align_m = _sublane_align(mxu_dtype, out_dtype)

    cost = pl.CostEstimate(
        flops=2 * batch * out_features * c_in,
        transcendentals=0,
        bytes_accessed=(batch * c_in * x_bytes
                        + kp * np_ * w_bytes
                        + batch * out_features * o_bytes),
    )

    # ---------------- fast path: whole weight VMEM-resident ----------------
    def fast_path_bytes(tm):
        # double-buffered x and out tiles + (double-buffered) constant weight
        return 2 * (tm * kp * x_bytes + kp * np_ * w_bytes + tm * np_ * o_bytes)

    if fast_path_bytes(align_m) <= _vmem_budget:
        tm, bp = _choose_batch_tile(batch, align_m, tm_target)
        while tm > align_m and fast_path_bytes(tm) > _vmem_budget:
            tm = max(align_m, ((tm // 2) // align_m) * align_m)
            bp = _round_up(batch, tm)
        # v7x megacore: give the 1-D "parallel" grid >= 2 blocks when B allows.
        if bp // tm < 2 and bp >= 2 * align_m:
            tm = _round_up(_cdiv(bp, 2), align_m)
            bp = _round_up(batch, tm)

        if (bp, kp) != x.shape:
            x = jnp.pad(x, ((0, bp - batch), (0, kp - c_in)))

        out_padded = pl.pallas_call(
            _proj_kernel_resident,
            out_shape=jax.ShapeDtypeStruct((bp, np_), out_dtype),
            grid_spec=pltpu.PrefetchScalarGridSpec(
                num_scalar_prefetch=0,
                grid=(bp // tm,),
                in_specs=[
                    pl.BlockSpec((tm, kp), lambda i: (i, 0)),     # activations
                    pl.BlockSpec((kp, np_), lambda i: (0, 0)),    # resident weight
                ],
                out_specs=pl.BlockSpec((tm, np_), lambda i: (i, 0)),
            ),
            compiler_params=pltpu.CompilerParams(
                dimension_semantics=("parallel",),
                vmem_limit_bytes=_VMEM_LIMIT_BYTES,
            ),
            cost_estimate=cost,
        )(x, w_prepared)
        return out_padded[:batch, :out_features]

    # ---------------- general K-split fallback (huge weights) --------------
    tm, bp = _choose_batch_tile(batch, align_m, tm_target)
    tn = _pick_tile(np_, tn_target, _LANE)
    tk = _pick_tile(kp, tk_target, _LANE)
    if (bp, kp) != x.shape:
        x = jnp.pad(x, ((0, bp - batch), (0, kp - c_in)))

    out_padded = pl.pallas_call(
        _proj_kernel_ksplit,
        out_shape=jax.ShapeDtypeStruct((bp, np_), out_dtype),
        grid_spec=pltpu.PrefetchScalarGridSpec(
            num_scalar_prefetch=0,
            grid=(bp // tm, np_ // tn, kp // tk),
            in_specs=[
                pl.BlockSpec((tm, tk), lambda i, j, k: (i, k)),
                pl.BlockSpec((tk, tn), lambda i, j, k: (k, j)),
            ],
            out_specs=pl.BlockSpec((tm, tn), lambda i, j, k: (i, j)),
            scratch_shapes=[pltpu.VMEM((tm, tn), jnp.float32)],
        ),
        compiler_params=pltpu.CompilerParams(
            dimension_semantics=("parallel", "parallel", "arbitrary"),
            vmem_limit_bytes=_VMEM_LIMIT_BYTES,
        ),
        cost_estimate=cost,
    )(x, w_prepared)
    return out_padded[:batch, :out_features]


def learned_projection_resolver(
    lower_level,
    higher_level,
    weight,
    *,
    compute_dtype=None,
    tm_target: int = 512,
):
    """Pallas equivalent of LearnedProjectionResolver.forward.

    Args:
      lower_level:  (B, C_in)   activations.
      higher_level: (B, C_out)  accepted for parity; only shape-checked (the
                    reference module merely logs its shape, no compute).
      weight:       (C_out, C_in) nn.Linear weight (no bias).
      compute_dtype: optional MXU-input dtype (jnp.bfloat16 recommended on
                    TPU); accumulation is f32, output keeps lower_level.dtype.
                    None (default) keeps f32 operands for bit-parity.

    If the weight is a persistent parameter, call prepare_projection_weight()
    once and apply_projection() per step to amortize the pad/cast/transpose.
    """
    c_out, c_in = weight.shape
    assert lower_level.shape[-1] == c_in, "weight/activation inner dims must match"
    if higher_level is not None:
        assert higher_level.shape[-1] == c_out  # shape-logged in the reference
    w_prepared = prepare_projection_weight(weight, compute_dtype=compute_dtype)
    return apply_projection(lower_level, w_prepared, c_out, tm_target=tm_target)


def xavier_uniform_weight(key, fan_out, fan_in, dtype=jnp.float32):
    """Xavier-uniform init matching nn.init.xavier_uniform_ on (fan_out, fan_in)."""
    bound = jnp.sqrt(6.0 / (fan_in + fan_out))
    return jax.random.uniform(
        key, (fan_out, fan_in), dtype=dtype, minval=-bound, maxval=bound
    )


if __name__ == "__main__":
    # Small, deterministic shapes consistent with the module's forward:
    #   lower_level:  (B, embed_dim), higher_level: (B, projection_dim)
    B = 8
    embed_dim = 32
    projection_dim = 64

    key = jax.random.PRNGKey(0)
    k_w, k_lo, k_hi, k_bx, k_bw = jax.random.split(key, 5)

    weight = xavier_uniform_weight(k_w, projection_dim, embed_dim)            # (C_out, C_in)
    lower_level = jax.random.normal(k_lo, (B, embed_dim), dtype=jnp.float32)
    higher_level = jax.random.normal(k_hi, (B, projection_dim), dtype=jnp.float32)

    out = jax.block_until_ready(
        learned_projection_resolver(lower_level, higher_level, weight)
    )
    ref = lower_level @ weight.T
    assert out.shape == (B, projection_dim)
    assert jnp.allclose(out, ref, atol=1e-5, rtol=1e-5)

    # Larger, awkward (non-128-multiple) shapes using the recommended
    # production configuration: prepared (amortized) bf16 weight + the
    # weight-resident fast path with a megacore-friendly batch split.
    big_B, big_cin, big_cout = 512, 384, 640
    big_x = jax.random.normal(k_bx, (big_B, big_cin), dtype=jnp.float32)
    big_w = xavier_uniform_weight(k_bw, big_cout, big_cin)
    w_prep = prepare_projection_weight(big_w, compute_dtype=jnp.bfloat16)
    big_ref = big_x @ big_w.T

    big_out = jax.block_until_ready(apply_projection(big_x, w_prep, big_cout))
    assert big_out.shape == (big_B, big_cout)
    assert jnp.allclose(big_out, big_ref, atol=2e-1, rtol=2e-2)   # bf16 tolerance

    # Exercise the general K-split fallback path end-to-end as well
    # (forced by a zero fast-path VMEM budget).
    big_out2 = jax.block_until_ready(
        apply_projection(big_x, w_prep, big_cout, _vmem_budget=0)
    )
    assert jnp.allclose(big_out2, big_ref, atol=2e-1, rtol=2e-2)

    print("KERNEL_OK")
</pallas_src>

<mosaic_0001>
module attributes {stable_mosaic.version = 11 : i64} {
  func.func @_proj_kernel_resident(%arg0: i32, %arg1: memref<8x128xf32, #tpu.memory_space<vmem>>, %arg2: memref<128x128xf32, #tpu.memory_space<vmem>>, %arg3: memref<8x128xf32, #tpu.memory_space<vmem>>) attributes {dimension_semantics = [#tpu.dimension_semantics<parallel>], iteration_bounds = array<i64: 1>, scalar_prefetch = 0 : i64, scratch_operands = 0 : i64, tpu.core_type = #tpu.core_type<tc>, window_params = [{transform_indices = @transform_0, window_bounds = array<i64: 8, 128>}, {pipeline_mode = #tpu.pipeline_mode<synchronous>, transform_indices = @transform_1, window_bounds = array<i64: 128, 128>}, {transform_indices = @transform_2, window_bounds = array<i64: 8, 128>}]} {
    %c0 = arith.constant 0 : index
    %c0_0 = arith.constant 0 : index
    %0 = vector.load %arg1[%c0, %c0_0] : memref<8x128xf32, #tpu.memory_space<vmem>>, vector<8x128xf32>
    %c0_1 = arith.constant 0 : index
    %c0_2 = arith.constant 0 : index
    %1 = vector.load %arg2[%c0_1, %c0_2] : memref<128x128xf32, #tpu.memory_space<vmem>>, vector<128x128xf32>
    %cst = arith.constant dense<0.000000e+00> : vector<8x128xf32>
    %2 = tpu.matmul %0, %1, %cst {dimension_numbers = #tpu.dot_dimension_numbers<[1], [0], [0], [1], [0, 0, 1, 1], [], []>} : vector<8x128xf32>, vector<128x128xf32>, vector<8x128xf32> -> vector<8x128xf32>
    %c0_3 = arith.constant 0 : index
    %c0_4 = arith.constant 0 : index
    %3 = vector.load %arg3[%c0_3, %c0_4] : memref<8x128xf32, #tpu.memory_space<vmem>>, vector<8x128xf32>
    tpu.vector_store %arg3[%c0_3, %c0_4], %2 {strides = array<i32>} : memref<8x128xf32, #tpu.memory_space<vmem>>, vector<8x128xf32>,
    return
  }
  func.func @transform_0(%arg0: i32) -> (i32, i32) {
    %c0_i32 = arith.constant 0 : i32
    %c0_i32_0 = arith.constant 0 : i32
    return %arg0, %c0_i32 : i32, i32
  }
  func.func @transform_1(%arg0: i32) -> (i32, i32) {
    %c0_i32 = arith.constant 0 : i32
    %c0_i32_0 = arith.constant 0 : i32
    %c0_i32_1 = arith.constant 0 : i32
    return %c0_i32, %c0_i32_0 : i32, i32
  }
  func.func @transform_2(%arg0: i32) -> (i32, i32) {
    %c0_i32 = arith.constant 0 : i32
    %c0_i32_0 = arith.constant 0 : i32
    return %arg0, %c0_i32 : i32, i32
  }
}

</mosaic_0001>

<bundles_post_ra>
// kernel: tpu_custom_call.1
= control target key start
LH: loop header
LB: loop body
LE: loop exit
PB: predicated region body
PF: predicated region fallthrough
CT: control target
= control target key end

     0   :  { %7 = vsyncpa [#allocation3], 0  ;;  %s364_s0 = inlined_call_operand.hbm [shape: f32[8,128], index: 0, kind: input, shape index: {}]   ;;  %s365_s1 = inlined_call_operand.hbm [shape: f32[128,128], index: 1, kind: input, shape index: {}]   ;;  %s366_s2 = inlined_call_operand.hbm [shape: f32[8,128], index: 2, kind: output, shape index: {}]  }
   0x1   :  { %8 = vsyncpa [#allocation6], 0 }
   0x2   :  { %9 = vsyncpa [#allocation4], 0  ;;  %s298_s9 = smov [#allocation2]   ;;  %s299_s11 = smov [#allocation5]  }
   0x3   :  { %s16_s10 = sshll.u32 %s298_s9, 4  ;;  %s25_s12 = sshll.u32 %s299_s11, 4  ;;  %s17_s10 = int_to_ptr.vmem [resolvable:$true] %s16_s10  ;;  %s321_s12 = int_to_ptr.vmem [resolvable:$true] %s25_s12 }
   0x4   :  { %s226_s15 = scalar_lea.hbm %s364_s0, 128 }
   0x5   :  { %p227_p0 = scmp.ne.s32.totalorder %s364_s0, %s226_s15  ;;  %p230_p1 = scmp.lt.u32.totalorder %s226_s15, %s364_s0 }
   0x7   :  { %p232_p2 = pnand %p230_p1, %p227_p0 }
   0x9   :  { %235 = shalt.err (!%p232_p2)
}
   0xa   :  { %s236_s20 = scalar_lea.vmem %s17_s10, 128  ;;  %p241_p4 = scmp.lt.s32.totalorder %s17_s10, %s17_s10 }
   0xb   :  { %p237_p3 = scmp.ne.s32.totalorder %s17_s10, %s236_s20  ;;  %p242_p5 = scmp.lt.s32.totalorder %s236_s20, %s236_s20 }
   0xd   :  { %p243_p6 = por %p242_p5, %p241_p4 }
   0xf   :  { %p244_p7 = pnand %p243_p6, %p237_p3 }
  0x11   :  { %247 = shalt.err (!%p244_p7)
}
  0x12   :  { %19 = dma.hbm_to_vmem [thread:$0]  %s364_s0, 128, %s17_s10, [#allocation3]  }
  0x13   :  { %s248_s25 = scalar_lea.hbm %s365_s1, 2048 }
  0x14   :  { %p249_p8 = scmp.ne.s32.totalorder %s365_s1, %s248_s25  ;;  %p252_p9 = scmp.lt.u32.totalorder %s248_s25, %s365_s1 }
  0x16   :  { %p254_p10 = pnand %p252_p9, %p249_p8 }
  0x18   :  { %257 = shalt.err (!%p254_p10)
}
  0x19   :  { %s258_s30 = scalar_lea.vmem %s321_s12, 2048  ;;  %p263_p12 = scmp.lt.s32.totalorder %s321_s12, %s321_s12 }
  0x1a   :  { %p259_p11 = scmp.ne.s32.totalorder %s321_s12, %s258_s30  ;;  %p264_p13 = scmp.lt.s32.totalorder %s258_s30, %s258_s30 }
  0x1c   :  { %p265_p0 = por %p264_p13, %p263_p12 }
  0x1e   :  { %p266_p1 = pnand %p265_p0, %p259_p11 }
  0x20   :  { %269 = shalt.err (!%p266_p1)
}
  0x21   :  { %s300_s0 = smov 128   ;;  %s301_s3 = smov 8  }
  0x22   :  { %31 = dma.hbm_to_vmem [thread:$0]  %s365_s1, 2048, %s321_s12, [#allocation6], %s300_s0, %s300_s0, %s301_s3  }
  0x23   :  { %292 = dma.done.wait [#allocation3], 128  }
  0x24   :  { %293 = vsyncadd [#allocation3], 4294967168 }
  0x25   :  { %294 = dma.done.wait [#allocation6], 2048  }
  0x26   :  { %295 = vsyncadd [#allocation6], 4294965248  ;;  %v302_v0 = vmov 0.0|0.0   ;;  %vm303_vm0 = vmmov 0   ;;  %v304_v1 = vmov 0.0   ;;  %v39_v2 = vld [vmem:[#allocation5] sm:$0xff] }
  0x27   :  { %194 = vmatprep.subr.bf16.mxu0 %v302_v0  ;;  %191 = vmatprep.mubr.msk.f32.mxu0 %vm303_vm0, %v304_v1  ;;  %v40_v3 = vld [vmem:[#allocation5 + $0x8] sm:$0xff]  ;;  %v41_v4 = vld [vmem:[#allocation5 + $0x10] sm:$0xff]  ;;  %v42_v6 = vld [vmem:[#allocation5 + $0x18] sm:$0xff]  ;;  %s305_s1 = smov [#allocation7]  }
  0x28   :  { %v195_v5 = vpack.c.bf16 %v40_v3, %v39_v2  ;;  %v198_v7 = vpack.c.bf16 %v42_v6, %v41_v4  ;;  %v43_v8 = vld [vmem:[#allocation5 + $0x20] sm:$0xff]  ;;  %v44_v9 = vld [vmem:[#allocation5 + $0x28] sm:$0xff]  ;;  %v45_v11 = vld [vmem:[#allocation5 + $0x30] sm:$0xff]  ;;  %s132_s6 = sshll.u32 %s305_s1, 4  ;;  %s133_s6 = int_to_ptr.vmem [resolvable:$true] %s132_s6 }
  0x29   :  { %v201_v10 = vpack.c.bf16 %v44_v9, %v43_v8  ;;  %v46_v12 = vld [vmem:[#allocation5 + $0x38] sm:$0xff]  ;;  %v47_v14 = vld [vmem:[#allocation5 + $0x40] sm:$0xff]  ;;  %v48_v15 = vld [vmem:[#allocation5 + $0x48] sm:$0xff]  ;;  %s270_s7 = scalar_lea.vmem %s133_s6, 128  ;;  %p275_p3 = scmp.lt.s32.totalorder %s133_s6, %s133_s6 }
  0x2a   :  { %196 = vmatpush3.bf16.msra.mxu0 %v195_v5  ;;  %v204_v13 = vpack.c.bf16 %v46_v12, %v45_v11  ;;  %v207_v16 = vpack.c.bf16 %v48_v15, %v47_v14  ;;  %v49_v17 = vld [vmem:[#allocation5 + $0x50] sm:$0xff]  ;;  %v50_v18 = vld [vmem:[#allocation5 + $0x58] sm:$0xff]  ;;  %v51_v20 = vld [vmem:[#allocation5 + $0x60] sm:$0xff]  ;;  %p271_p2 = scmp.ne.s32.totalorder %s133_s6, %s270_s7  ;;  %p276_p4 = scmp.lt.s32.totalorder %s270_s7, %s270_s7 }
  0x2b   :  { %197 = vmatprep.subr.bf16.mxu0 %v302_v0  ;;  %v210_v19 = vpack.c.bf16 %v50_v18, %v49_v17  ;;  %v52_v21 = vld [vmem:[#allocation5 + $0x68] sm:$0xff]  ;;  %v53_v23 = vld [vmem:[#allocation5 + $0x70] sm:$0xff]  ;;  %v54_v24 = vld [vmem:[#allocation5 + $0x78] sm:$0xff] }
  0x2c   :  { %v213_v22 = vpack.c.bf16 %v52_v21, %v51_v20  ;;  %v216_v25 = vpack.c.bf16 %v54_v24, %v53_v23  ;;  %v38_v26 = vld [vmem:[#allocation2] sm:$0xff]  ;;  %p277_p5 = por %p276_p4, %p275_p3 }
  0x2e   :  { %199 = vmatpush3.bf16.msra.mxu0 %v198_v7  ;;  %p278_p6 = pnand %p277_p5, %p271_p2 }
  0x2f   :  { %200 = vmatprep.subr.bf16.mxu0 %v302_v0 }
  0x32   :  { %202 = vmatpush3.bf16.msra.mxu0 %v201_v10 }
  0x33   :  { %203 = vmatprep.subr.bf16.mxu0 %v302_v0 }
  0x36   :  { %205 = vmatpush3.bf16.msra.mxu0 %v204_v13 }
  0x37   :  { %206 = vmatprep.subr.bf16.mxu0 %v302_v0 }
  0x3a   :  { %208 = vmatpush3.bf16.msra.mxu0 %v207_v16 }
  0x3b   :  { %209 = vmatprep.subr.bf16.mxu0 %v302_v0 }
  0x3e   :  { %211 = vmatpush3.bf16.msra.mxu0 %v210_v19 }
  0x3f   :  { %212 = vmatprep.subr.bf16.mxu0 %v302_v0 }
  0x42   :  { %214 = vmatpush3.bf16.msra.mxu0 %v213_v22 }
  0x43   :  { %215 = vmatprep.subr.bf16.mxu0 %v302_v0 }
  0x46   :  { %217 = vmatpush3.bf16.msra.mxu0 %v216_v25 }
  0x49   :  { %192 = vmatmul.mubr.f32.vlgmr.msra.gmra.mrb[0].mxu0 %v38_v26 }
 0x11c   :  { %v121_v27 = vpop.f32.mrb[0].mxu0 }
 0x11d   :  { %125 = vst [vmem:[#allocation7] sm:$0xff] %v121_v27  ;;  %v193_v28 = vpop.f32.mrb[1].mxu0 }
 0x11e   :  { %281 = shalt.err (!%p278_p6)
}
 0x11f   :  { %s282_s10 = scalar_lea.hbm %s366_s2, 128 }
 0x120   :  { %p283_p7 = scmp.ne.s32.totalorder %s366_s2, %s282_s10  ;;  %p286_p8 = scmp.lt.u32.totalorder %s282_s10, %s366_s2 }
 0x122   :  { %p288_p9 = pnand %p286_p8, %p283_p7 }
 0x124   :  { %291 = shalt.err (!%p288_p9)
}
 0x125   :  { %135 = dma.vmem_to_hbm [thread:$0]  %s133_s6, 128, %s366_s2, [#allocation4]  }
 0x126   :  { %296 = dma.done.wait [#allocation4], 128  }
 0x127   :  { %297 = vsyncadd [#allocation4], 4294967168 }
 0x128   :  { %139 = vsyncpa [#allocation3], 1 }
 0x129   :  { %140 = vsyncpa [#allocation6], 1 }
 0x12a   :  { %141 = vsyncpa [#allocation4], 1 }

</bundles_post_ra>
